<compile_context>
chip_gen: v5e
topology: v5e:2x2
jax: 0.10.0
libtpu: 0.0.40
codegen_flags: <defaults>
</compile_context>

<pallas_src>
import functools

import jax
import jax.numpy as jnp
from jax.experimental import pallas as pl
from jax.experimental.pallas import tpu as pltpu


LANE = 128      # lane width: pad feature dims to multiples of this
SUBLANE = 8     # sublane width: batch tiles are multiples of this


def _round_up(x: int, m: int) -> int:
    return (x + m - 1) // m * m


def _cdiv(a: int, b: int) -> int:
    return -(-a // b)


# ---------------------------------------------------------------------------
# Fused MLP kernel: one grid step = one batch tile through ALL layers.
#   x_ref : (tm, Kp)      f32
#   w_ref : (L, Kp, Np)   bf16   (VMEM-resident, same block every step)
#   b_ref : (L, 1, Np)    f32
#   o_ref : (tm, Np)      f32
# ---------------------------------------------------------------------------
def _mlp_kernel(x_ref, w_ref, b_ref, o_ref, *, num_layers: int):
    h = x_ref[...]                                     # (tm, Kp) f32
    for layer in range(num_layers):                    # unrolled Python loop
        w = w_ref[layer]                               # (Kp, Np) bf16
        b = b_ref[layer]                               # (1, Np)  f32
        # bf16 MXU inputs, f32 accumulation.
        h = jnp.dot(h.astype(jnp.bfloat16), w,
                    preferred_element_type=jnp.float32) + b
        if layer < num_layers - 1:
            h = jnp.tanh(h)                            # EUP slot, f32
    o_ref[...] = h.astype(o_ref.dtype)                 # lane-dense store


# ---------------------------------------------------------------------------
# Parameter init (mirrors nn.Linear U(-1/sqrt(fan_in), 1/sqrt(fan_in)))
# ---------------------------------------------------------------------------
def init_params(key, input_size, hidden_sizes):
    dims = [input_size] + list(hidden_sizes) + [1]
    params = []
    for i in range(len(dims) - 1):
        fan_in, fan_out = dims[i], dims[i + 1]
        key, kw, kb = jax.random.split(key, 3)
        bound = 1.0 / (fan_in ** 0.5)
        # stored as (in, out) so the kernel does x @ w directly
        w = jax.random.uniform(kw, (fan_in, fan_out), jnp.float32, -bound, bound)
        b = jax.random.uniform(kb, (fan_out,), jnp.float32, -bound, bound)
        params.append((w, b))
    return params


def pad_params(params):
    """Zero-pad every layer to ONE lane-aligned (Kmax, Nmax) and stack.

    Returns (w_stack bf16 (L,Kp,Np), b_stack f32 (L,1,Np), Kp, Np).
    Padding is semantics-preserving: extra weight rows/cols and biases are
    zero, so padded activation lanes stay 0 through tanh and the next layer.
    """
    kmax = max(_round_up(w.shape[0], LANE) for w, _ in params)
    nmax = max(_round_up(w.shape[1], LANE) for w, _ in params)
    w_list, b_list = [], []
    for w, b in params:
        k, n = w.shape
        w_p = jnp.zeros((kmax, nmax), jnp.float32).at[:k, :n].set(w)
        b_p = jnp.zeros((1, nmax), jnp.float32).at[0, :n].set(b)
        w_list.append(w_p)
        b_list.append(b_p)
    w_stack = jnp.stack(w_list, axis=0).astype(jnp.bfloat16)   # (L, Kp, Np)
    b_stack = jnp.stack(b_list, axis=0)                        # (L, 1, Np) f32
    return w_stack, b_stack, kmax, nmax


# ---------------------------------------------------------------------------
# Single fused pallas_call for the whole forward pass
# ---------------------------------------------------------------------------
def model_forward_fused(padded, x):
    w_stack, b_stack, kp, np_ = padded
    num_layers = w_stack.shape[0]
    B, K = x.shape

    # ----- batch tile selection: VMEM-budget-driven, padding-minimizing -----
    # Per-row bytes in flight: double-buffered x + out tiles (f32) plus
    # headroom for the staged intermediate activation.
    per_row_bytes = 2 * (kp + np_) * 4 + 2 * np_ * 4
    tile_budget = 12 << 20                      # ~12 MiB for batch tiles
    tm_cap = max(SUBLANE, min(2048, (tile_budget // per_row_bytes) // SUBLANE * SUBLANE))

    bp8 = _round_up(B, SUBLANE)
    num_tiles = _cdiv(bp8, tm_cap)
    if bp8 > 256 and num_tiles < 2:
        num_tiles = 2                           # give v7x's 2 TCs work
    if num_tiles > 1 and num_tiles % 2 == 1:
        num_tiles += 1                          # even split across 2 TCs
    tm = _round_up(_cdiv(bp8, num_tiles), SUBLANE)
    bp = tm * num_tiles

    # ----- explicit VMEM budget -> vmem_limit_bytes -----
    w_bytes = int(w_stack.size) * 2
    b_bytes = int(b_stack.size) * 4
    io_bytes = 2 * tm * (kp + np_) * 4          # double-buffered x/out tiles
    act_bytes = 2 * tm * np_ * 4                # intermediate staging headroom
    budget = 2 * (w_bytes + b_bytes) + io_bytes + act_bytes
    vmem_limit = min(64 << 20, max(2 * budget, 32 << 20))

    # Pad input to (bp, kp): zero cols meet zero weight rows -> no effect.
    if (B, K) != (bp, kp):
        x_p = jnp.zeros((bp, kp), jnp.float32).at[:B, :K].set(x)
    else:
        x_p = x.astype(jnp.float32)

    out = pl.pallas_call(
        functools.partial(_mlp_kernel, num_layers=num_layers),
        out_shape=jax.ShapeDtypeStruct((bp, np_), jnp.float32),
        grid=(num_tiles,),
        in_specs=[
            pl.BlockSpec((tm, kp), lambda i: (i, 0)),
            pl.BlockSpec((num_layers, kp, np_), lambda i: (0, 0, 0)),  # weights: resident
            pl.BlockSpec((num_layers, 1, np_), lambda i: (0, 0, 0)),   # biases: resident
        ],
        out_specs=pl.BlockSpec((tm, np_), lambda i: (i, 0)),
        compiler_params=pltpu.CompilerParams(
            dimension_semantics=("parallel",),   # batch tiles independent -> megacore
            vmem_limit_bytes=int(vmem_limit),
        ),
    )(x_p, w_stack, b_stack)

    # Strip batch padding and the 128-lane padding of the scalar output.
    return out[:B, :1]


# ---------------------------------------------------------------------------
# Pure-JAX f32 reference (uses the UNpadded params)
# ---------------------------------------------------------------------------
def model_forward_ref(params, x):
    n = len(params)
    h = x
    for idx, (w, b) in enumerate(params):
        h = h @ w + b
        if idx < n - 1:
            h = jnp.tanh(h)
    return h


if __name__ == "__main__":
    batch = 8
    input_size = 32
    hidden_sizes = [64, 48]

    key = jax.random.PRNGKey(0)
    key, kx = jax.random.split(key)
    x = jax.random.normal(kx, (batch, input_size), jnp.float32)

    params = init_params(key, input_size, hidden_sizes)
    padded = pad_params(params)    # padded + stacked once, reused every call

    out = model_forward_fused(padded, x)
    out = jax.block_until_ready(out)

    ref = model_forward_ref(params, x)
    assert out.shape == (batch, 1), out.shape
    # bf16 MXU inputs -> relaxed tolerance vs the f32 reference.
    assert jnp.allclose(out, ref, atol=2e-2, rtol=2e-2), "mismatch vs reference"

    print("KERNEL_OK")
</pallas_src>

<mosaic_0001>
module attributes {stable_mosaic.version = 11 : i64} {
  func.func @_mlp_kernel(%arg0: i32, %arg1: memref<8x128xf32, #tpu.memory_space<vmem>>, %arg2: memref<3x128x128xbf16, #tpu.memory_space<vmem>>, %arg3: memref<3x1x128xf32, #tpu.memory_space<vmem>>, %arg4: memref<8x128xf32, #tpu.memory_space<vmem>>) attributes {dimension_semantics = [#tpu.dimension_semantics<parallel>], iteration_bounds = array<i64: 1>, scalar_prefetch = 0 : i64, scratch_operands = 0 : i64, tpu.core_type = #tpu.core_type<tc>, window_params = [{transform_indices = @transform_0, window_bounds = array<i64: 8, 128>}, {pipeline_mode = #tpu.pipeline_mode<synchronous>, transform_indices = @transform_1, window_bounds = array<i64: 3, 128, 128>}, {pipeline_mode = #tpu.pipeline_mode<synchronous>, transform_indices = @transform_2, window_bounds = array<i64: 3, 1, 128>}, {transform_indices = @transform_3, window_bounds = array<i64: 8, 128>}]} {
    %c0 = arith.constant 0 : index
    %c0_0 = arith.constant 0 : index
    %0 = vector.load %arg1[%c0, %c0_0] : memref<8x128xf32, #tpu.memory_space<vmem>>, vector<8x128xf32>
    %c0_1 = arith.constant 0 : index
    %c0_2 = arith.constant 0 : index
    %c0_3 = arith.constant 0 : index
    %1 = vector.load %arg2[%c0_1, %c0_2, %c0_3] : memref<3x128x128xbf16, #tpu.memory_space<vmem>>, vector<1x128x128xbf16>
    %2 = vector.shape_cast %1 : vector<1x128x128xbf16> to vector<128x128xbf16>
    %c0_4 = arith.constant 0 : index
    %c0_5 = arith.constant 0 : index
    %c0_6 = arith.constant 0 : index
    %3 = vector.load %arg3[%c0_4, %c0_5, %c0_6] : memref<3x1x128xf32, #tpu.memory_space<vmem>>, vector<1x1x128xf32>
    %4 = vector.shape_cast %3 : vector<1x1x128xf32> to vector<1x128xf32>
    %5 = arith.truncf %0 : vector<8x128xf32> to vector<8x128xbf16>
    %cst = arith.constant dense<0.000000e+00> : vector<8x128xf32>
    %6 = tpu.matmul %5, %2, %cst {dimension_numbers = #tpu.dot_dimension_numbers<[1], [0], [0], [1], [0, 0, 1, 1], [], []>} : vector<8x128xbf16>, vector<128x128xbf16>, vector<8x128xf32> -> vector<8x128xf32>
    %7 = vector.broadcast %4 : vector<1x128xf32> to vector<8x128xf32>
    %8 = arith.addf %6, %7 : vector<8x128xf32>
    %9 = math.tanh %8 : vector<8x128xf32>
    %c1 = arith.constant 1 : index
    %c0_7 = arith.constant 0 : index
    %c0_8 = arith.constant 0 : index
    %10 = vector.load %arg2[%c1, %c0_7, %c0_8] : memref<3x128x128xbf16, #tpu.memory_space<vmem>>, vector<1x128x128xbf16>
    %11 = vector.shape_cast %10 : vector<1x128x128xbf16> to vector<128x128xbf16>
    %c1_9 = arith.constant 1 : index
    %c0_10 = arith.constant 0 : index
    %c0_11 = arith.constant 0 : index
    %12 = vector.load %arg3[%c1_9, %c0_10, %c0_11] : memref<3x1x128xf32, #tpu.memory_space<vmem>>, vector<1x1x128xf32>
    %13 = vector.shape_cast %12 : vector<1x1x128xf32> to vector<1x128xf32>
    %14 = arith.truncf %9 : vector<8x128xf32> to vector<8x128xbf16>
    %cst_12 = arith.constant dense<0.000000e+00> : vector<8x128xf32>
    %15 = tpu.matmul %14, %11, %cst_12 {dimension_numbers = #tpu.dot_dimension_numbers<[1], [0], [0], [1], [0, 0, 1, 1], [], []>} : vector<8x128xbf16>, vector<128x128xbf16>, vector<8x128xf32> -> vector<8x128xf32>
    %16 = vector.broadcast %13 : vector<1x128xf32> to vector<8x128xf32>
    %17 = arith.addf %15, %16 : vector<8x128xf32>
    %18 = math.tanh %17 : vector<8x128xf32>
    %c2 = arith.constant 2 : index
    %c0_13 = arith.constant 0 : index
    %c0_14 = arith.constant 0 : index
    %19 = vector.load %arg2[%c2, %c0_13, %c0_14] : memref<3x128x128xbf16, #tpu.memory_space<vmem>>, vector<1x128x128xbf16>
    %20 = vector.shape_cast %19 : vector<1x128x128xbf16> to vector<128x128xbf16>
    %c2_15 = arith.constant 2 : index
    %c0_16 = arith.constant 0 : index
    %c0_17 = arith.constant 0 : index
    %21 = vector.load %arg3[%c2_15, %c0_16, %c0_17] : memref<3x1x128xf32, #tpu.memory_space<vmem>>, vector<1x1x128xf32>
    %22 = vector.shape_cast %21 : vector<1x1x128xf32> to vector<1x128xf32>
    %23 = arith.truncf %18 : vector<8x128xf32> to vector<8x128xbf16>
    %cst_18 = arith.constant dense<0.000000e+00> : vector<8x128xf32>
    %24 = tpu.matmul %23, %20, %cst_18 {dimension_numbers = #tpu.dot_dimension_numbers<[1], [0], [0], [1], [0, 0, 1, 1], [], []>} : vector<8x128xbf16>, vector<128x128xbf16>, vector<8x128xf32> -> vector<8x128xf32>
    %25 = vector.broadcast %22 : vector<1x128xf32> to vector<8x128xf32>
    %26 = arith.addf %24, %25 : vector<8x128xf32>
    %c0_19 = arith.constant 0 : index
    %c0_20 = arith.constant 0 : index
    %27 = vector.load %arg4[%c0_19, %c0_20] : memref<8x128xf32, #tpu.memory_space<vmem>>, vector<8x128xf32>
    tpu.vector_store %arg4[%c0_19, %c0_20], %26 {strides = array<i32>} : memref<8x128xf32, #tpu.memory_space<vmem>>, vector<8x128xf32>,
    return
  }
  func.func @transform_0(%arg0: i32) -> (i32, i32) {
    %c0_i32 = arith.constant 0 : i32
    %c0_i32_0 = arith.constant 0 : i32
    return %arg0, %c0_i32 : i32, i32
  }
  func.func @transform_1(%arg0: i32) -> (i32, i32, i32) {
    %c0_i32 = arith.constant 0 : i32
    %c0_i32_0 = arith.constant 0 : i32
    %c0_i32_1 = arith.constant 0 : i32
    %c0_i32_2 = arith.constant 0 : i32
    return %c0_i32, %c0_i32_0, %c0_i32_1 : i32, i32, i32
  }
  func.func @transform_2(%arg0: i32) -> (i32, i32, i32) {
    %c0_i32 = arith.constant 0 : i32
    %c0_i32_0 = arith.constant 0 : i32
    %c0_i32_1 = arith.constant 0 : i32
    %c0_i32_2 = arith.constant 0 : i32
    return %c0_i32, %c0_i32_0, %c0_i32_1 : i32, i32, i32
  }
  func.func @transform_3(%arg0: i32) -> (i32, i32) {
    %c0_i32 = arith.constant 0 : i32
    %c0_i32_0 = arith.constant 0 : i32
    return %arg0, %c0_i32 : i32, i32
  }
}

</mosaic_0001>

<bundles_post_ra>
// kernel: tpu_custom_call.1
= control target key start
LH: loop header
LB: loop body
LE: loop exit
PB: predicated region body
PF: predicated region fallthrough
CT: control target
= control target key end

     0   :  { %8 = vsyncpa [#allocation3], 0  ;;  %s609_s0 = inlined_call_operand.hbm [shape: f32[8,128], index: 0, kind: input, shape index: {}]   ;;  %s610_s1 = inlined_call_operand.hbm [shape: bf16[3,128,128], index: 1, kind: input, shape index: {}]   ;;  %s611_s2 = inlined_call_operand.hbm [shape: f32[3,1,128], index: 2, kind: input, shape index: {}]   ;;  %s612_s3 = inlined_call_operand.hbm [shape: f32[8,128], index: 3, kind: output, shape index: {}]  }
   0x1   :  { %9 = vsyncpa [#allocation6], 0  ;;  %s26_s14 = sshll.u32 %s610_s1, 4  ;;  %s27_s14 = int_to_ptr.hbm [resolvable:$true] %s26_s14 }
   0x2   :  { %10 = vsyncpa [#allocation4], 0  ;;  %s569_s15 = smov [#allocation5]   ;;  %s16_s19 = sshll.u32 %s609_s0, 4  ;;  %s17_s19 = int_to_ptr.hbm [resolvable:$true] %s16_s19 }
   0x3   :  { %s28_s16 = sshll.u32 %s569_s15, 4  ;;  %s570_s20 = smov 64   ;;  %s29_s16 = int_to_ptr.vmem [resolvable:$true] %s28_s16 }
   0x4   :  { %s571_s21 = smov 4   ;;  %s572_s22 = smov [#allocation2]  }
   0x5   :  { %34 = dma.hbm_to_vmem [thread:$0]  %s27_s14, 3072, %s29_s16, [#allocation6], %s570_s20, %s570_s20, %s571_s21  }
   0x6   :  { %s18_s23 = sshll.u32 %s572_s22, 4  ;;  %s39_s26 = sshll.u32 %s611_s2, 4  ;;  %s19_s23 = int_to_ptr.vmem [resolvable:$true] %s18_s23  ;;  %s40_s26 = int_to_ptr.hbm [resolvable:$true] %s39_s26 }
   0x7   :  { %21 = dma.hbm_to_vmem [thread:$0]  %s17_s19, 128, %s19_s23, [#allocation3]  }
   0x8   :  { %s573_s1 = smov [#allocation7]   ;;  %s574_s28 = smov 16  }
   0x9   :  { %s41_s27 = sshll.u32 %s573_s1, 4  ;;  %s575_s29 = smov 1   ;;  %s42_s27 = int_to_ptr.vmem [resolvable:$true] %s41_s27 }
   0xa   :  { %47 = dma.hbm_to_vmem [thread:$0]  %s40_s26, 48, %s42_s27, [#allocation6], %s574_s28, %s574_s28, %s575_s29  }
   0xb   :  { %563 = dma.done.wait [#allocation3], 128  }
   0xc   :  { %564 = vsyncadd [#allocation3], 4294967168 }
   0xd   :  { %565 = dma.done.wait [#allocation6], 3120  }
   0xe   :  { %566 = vsyncadd [#allocation6], 4294964176  ;;  %v435_v0 = vld [vmem:[#allocation5 + $0x38] sm:$0xff]  ;;  %v434_v1 = vld [vmem:[#allocation5 + $0x30] sm:$0xff]  ;;  %s576_s0 = smov [#allocation8]   ;;  %s321_s5 = sshll.u32 %s612_s3, 4  ;;  %s322_s5 = int_to_ptr.hbm [resolvable:$true] %s321_s5 }
   0xf   :  { %130 = vmatpush.bf16.msra.mxu0 %v435_v0  ;;  %v443_v2 = vld [vmem:[#allocation5 + $0x78] sm:$0xff]  ;;  %v442_v3 = vld [vmem:[#allocation5 + $0x70] sm:$0xff]  ;;  %v433_v4 = vld [vmem:[#allocation5 + $0x28] sm:$0xff]  ;;  %s319_s2 = sshll.u32 %s576_s0, 4  ;;  %s320_s2 = int_to_ptr.vmem [resolvable:$true] %s319_s2 }
  0x10   :  { %215 = vmatpush.bf16.msra.mxu1 %v443_v2  ;;  %v441_v5 = vld [vmem:[#allocation5 + $0x68] sm:$0xff]  ;;  %v432_v6 = vld [vmem:[#allocation5 + $0x20] sm:$0xff]  ;;  %v431_v8 = vld [vmem:[#allocation5 + $0x18] sm:$0xff] }
  0x11   :  { %v440_v7 = vld [vmem:[#allocation5 + $0x60] sm:$0xff]  ;;  %v439_v9 = vld [vmem:[#allocation5 + $0x58] sm:$0xff]  ;;  %v430_v10 = vld [vmem:[#allocation5 + $0x10] sm:$0xff] }
  0x12   :  { %v429_v11 = vld [vmem:[#allocation5 + $0x8] sm:$0xff]  ;;  %v428_v12 = vld [vmem:[#allocation5] sm:$0xff]  ;;  %v60_v13 = vld [vmem:[#allocation2] sm:$0xff] }
  0x13   :  { %131 = vmatpush.bf16.msra.mxu0 %v434_v1  ;;  %v78_v14 = vpack.c.bf16 %v60_v13, %v60_v13  ;;  %v438_v15 = vld [vmem:[#allocation5 + $0x50] sm:$0xff]  ;;  %v437_v16 = vld [vmem:[#allocation5 + $0x48] sm:$0xff]  ;;  %v436_v17 = vld [vmem:[#allocation5 + $0x40] sm:$0xff] }
  0x14   :  { %216 = vmatpush.bf16.msra.mxu1 %v442_v3  ;;  %v451_v18 = vld [vmem:[#allocation5 + $0xb8] sm:$0xff]  ;;  %v450_v19 = vld [vmem:[#allocation5 + $0xb0] sm:$0xff]  ;;  %v449_v20 = vld [vmem:[#allocation5 + $0xa8] sm:$0xff] }
  0x15   :  { %300 = vmatpush.bf16.msra.mxu2 %v451_v18  ;;  %v448_v21 = vld [vmem:[#allocation5 + $0xa0] sm:$0xff]  ;;  %v447_v22 = vld [vmem:[#allocation5 + $0x98] sm:$0xff]  ;;  %v446_v29 = vld [vmem:[#allocation5 + $0x90] sm:$0xff] }
  0x16   :  { %v460_v23 = vld [vmem:[#allocation7] ss:$0 sm:$0xff]  ;;  %v445_v30 = vld [vmem:[#allocation5 + $0x88] sm:$0xff]  ;;  %v461_v32 = vld [vmem:[#allocation7 + $0x1] ss:$0 sm:$0xff] }
  0x17   :  { %132 = vmatpush.bf16.msra.mxu0 %v433_v4  ;;  %v444_v31 = vld [vmem:[#allocation5 + $0x80] sm:$0xff] }
  0x18   :  { %217 = vmatpush.bf16.msra.mxu1 %v441_v5  ;;  %v462_v38 = vld [vmem:[#allocation7 + $0x2] ss:$0 sm:$0xff] }
  0x19   :  { %301 = vmatpush.bf16.msra.mxu2 %v450_v19 }
  0x1b   :  { %133 = vmatpush.bf16.msra.mxu0 %v432_v6 }
  0x1c   :  { %218 = vmatpush.bf16.msra.mxu1 %v440_v7 }
  0x1d   :  { %302 = vmatpush.bf16.msra.mxu2 %v449_v20 }
  0x1f   :  { %134 = vmatpush.bf16.msra.mxu0 %v431_v8 }
  0x20   :  { %219 = vmatpush.bf16.msra.mxu1 %v439_v9 }
  0x21   :  { %303 = vmatpush.bf16.msra.mxu2 %v448_v21 }
  0x23   :  { %135 = vmatpush.bf16.msra.mxu0 %v430_v10 }
  0x24   :  { %220 = vmatpush.bf16.msra.mxu1 %v438_v15 }
  0x25   :  { %304 = vmatpush.bf16.msra.mxu2 %v447_v22 }
  0x27   :  { %136 = vmatpush.bf16.msra.mxu0 %v429_v11 }
  0x28   :  { %221 = vmatpush.bf16.msra.mxu1 %v437_v16 }
  0x29   :  { %305 = vmatpush.bf16.msra.mxu2 %v446_v29 }
  0x2b   :  { %137 = vmatpush.bf16.msra.mxu0 %v428_v12 }
  0x2c   :  { %222 = vmatpush.bf16.msra.mxu1 %v436_v17 }
  0x2d   :  { %306 = vmatpush.bf16.msra.mxu2 %v445_v30 }
  0x2e   :  { %138 = vmatmul.bf16.vlgmr.msra.gmra.mxu0 %v78_v14 }
  0x31   :  { %307 = vmatpush.bf16.msra.mxu2 %v444_v31 }
  0xab   :  { %v139_v24 = vpop.f32.mrf.mxu0 }
  0xac   :  { %v140_v25 = vadd.f32 %v460_v23, %v139_v24 }
  0xae   :  { %463 = vtanh.f32 %v140_v25 }
  0xb3   :  { %v141_v26 = vpop.f32.mrf.mxu0 }
  0xb4   :  { %v464_v27 = vpop.eup %463 }
  0xb5   :  { %v163_v28 = vpack.c.bf16 %v464_v27, %v464_v27 }
  0xb7   :  { %223 = vmatmul.bf16.vlgmr.msra.gmra.mxu1 %v163_v28 }
 0x134   :  { %v224_v33 = vpop.f32.mrf.mxu1 }
 0x135   :  { %v225_v34 = vadd.f32 %v461_v32, %v224_v33 }
 0x137   :  { %465 = vtanh.f32 %v225_v34 }
 0x13c   :  { %v226_v35 = vpop.f32.mrf.mxu1 }
 0x13d   :  { %v466_v36 = vpop.eup %465 }
 0x13e   :  { %v248_v37 = vpack.c.bf16 %v466_v36, %v466_v36 }
 0x140   :  { %308 = vmatmul.bf16.vlgmr.msra.gmra.mxu2 %v248_v37 }
 0x1c3   :  { %v309_v39 = vpop.f32.mrf.mxu2 }
 0x1c4   :  { %v310_v40 = vadd.f32 %v462_v38, %v309_v39 }
 0x1c6   :  { %313 = vst [vmem:[#allocation8] sm:$0xff] %v310_v40 }
 0x1c7   :  { %324 = dma.vmem_to_hbm [thread:$0]  %s320_s2, 128, %s322_s5, [#allocation4]  }
 0x1cb   :  { %v311_v41 = vpop.f32.mrf.mxu2 }
 0x1cc   :  { %567 = dma.done.wait [#allocation4], 128  }
 0x1cd   :  { %568 = vsyncadd [#allocation4], 4294967168 }
 0x1ce   :  { %329 = vsyncpa [#allocation3], 1 }
 0x1cf   :  { %330 = vsyncpa [#allocation6], 1 }
 0x1d0   :  { %331 = vsyncpa [#allocation4], 1 }

</bundles_post_ra>
